<compile_context>
chip_gen: v7x
topology: tpu7x:2x2x1
jax: 0.10.0
libtpu: 0.0.40
codegen_flags: <defaults>
</compile_context>

<pallas_src>
import functools

import jax
import jax.numpy as jnp
from jax.experimental import pallas as pl
from jax.experimental.pallas import tpu as pltpu

NEG_SLOPE = 0.2          # TODO(synk): helper modules not shown; 0.2 (GAN convention) assumed.
BN_EPS = 1e-5
VMEM_LIMIT = 48 * 1024 * 1024   # below v7x's 64 MiB physical VMEM, above default scoped limit


def _leaky(y):
    return jnp.where(y > 0, y, NEG_SLOPE * y)


def _pick_co_tile(c_out):
    """256-wide output-channel tiles on v6e/v7x (2x256 MXU); 128 on v5e/older."""
    try:
        kind = jax.devices()[0].device_kind.lower()
    except Exception:
        kind = ""
    small_mxu = any(v in kind for v in ("v2", "v3", "v4", "v5"))
    if (not small_mxu) and c_out % 256 == 0:
        return 256
    if c_out % 128 == 0:
        return 128
    return c_out


# -----------------------------------------------------------------------------
# Dense (Linear, bias=False) + LeakyReLU
# -----------------------------------------------------------------------------
def _dense_kernel(z_ref, w_ref, o_ref):
    y = jnp.dot(z_ref[...], w_ref[...], preferred_element_type=jnp.float32)
    o_ref[...] = _leaky(y).astype(o_ref.dtype)


def dense_leakyrelu(z, w):
    B, K = z.shape
    N = w.shape[1]
    tn = N
    for cand in (2048, 1024, 512, 256, 128):
        if N % cand == 0:
            tn = cand
            break
    return pl.pallas_call(
        _dense_kernel,
        out_shape=jax.ShapeDtypeStruct((B, N), jnp.bfloat16),
        grid=(N // tn,),
        in_specs=[pl.BlockSpec((B, K), lambda j: (0, 0)),
                  pl.BlockSpec((K, tn), lambda j: (0, j))],
        out_specs=pl.BlockSpec((B, tn), lambda j: (0, j)),
        compiler_params=pltpu.CompilerParams(
            dimension_semantics=("parallel",),
            vmem_limit_bytes=VMEM_LIMIT),
    )(z.astype(jnp.bfloat16), w.astype(jnp.bfloat16))


# -----------------------------------------------------------------------------
# Fused ConvTranspose2d(k=4, s=2, p=1, bias=False) [+ BatchNorm2d + LeakyReLU]
#
# Decomposed into 4 output phases (output row/col parity). For phase (py,px),
# output[b, 2m+py, 2n+px, :] = sum over 4 taps (dy,dx) of
#     x_pad[b, m+py+dy, n+px+dx, :] @ w[3-py-2dy, 3-px-2dx]
# The 4 taps are collapsed into ONE matmul with K = 4*C_in: the kernel builds a
# tap-stacked activation (B, H+1, W+1, 4*C_in) once and slices per-phase; the
# wrapper pre-stacks the matching weights into (2, 2, 4*C_in, C_out).
# BN uses per-channel sum / sum-of-squares accumulated while the phases are
# produced (no read-back of the output block). The 4 phase tiles are
# interleaved in VMEM and stored once, lane-dense.
# -----------------------------------------------------------------------------
def _convT_kernel(x_ref, w_ref, g_ref, b_ref, o_ref, *, use_bn, use_act):
    B, H, W, C_in = x_ref.shape
    TCO = o_ref.shape[-1]
    M = B * H * W

    x = x_ref[...]
    dt = x.dtype

    # Fused zero-padding (stays in VMEM; no HBM pad roundtrip).
    zr = jnp.zeros((B, 1, W, C_in), dt)
    xp = jnp.concatenate([zr, x, zr], axis=1)                      # (B, H+2, W, C)
    zc = jnp.zeros((B, H + 2, 1, C_in), dt)
    xp = jnp.concatenate([zc, xp, zc], axis=2)                     # (B, H+2, W+2, C)

    # Tap-stacked tensor: channel block (dy,dx) is xp shifted by (dy,dx).
    xcat = jnp.concatenate(
        [xp[:, dy:dy + H + 1, dx:dx + W + 1, :] for dy in (0, 1) for dx in (0, 1)],
        axis=-1)                                                   # (B, H+1, W+1, 4C)

    phases = []
    if use_bn:
        csum = jnp.zeros((1, TCO), jnp.float32)
        csq = jnp.zeros((1, TCO), jnp.float32)
    for py in range(2):
        for px in range(2):
            lhs = xcat[:, py:py + H, px:px + W, :].reshape(M, 4 * C_in)
            acc = jnp.dot(lhs, w_ref[py, px],
                          preferred_element_type=jnp.float32)      # (M, TCO) f32
            if use_bn:
                csum = csum + jnp.sum(acc, axis=0, keepdims=True)
                csq = csq + jnp.sum(acc * acc, axis=0, keepdims=True)
            phases.append(acc)

    if use_bn:
        inv_n = 1.0 / (4.0 * M)
        mean = csum * inv_n
        var = jnp.maximum(csq * inv_n - mean * mean, 0.0)
        scale = jax.lax.rsqrt(var + BN_EPS) * g_ref[...]
        shift = b_ref[...] - mean * scale

    out_tiles = []
    for acc in phases:
        y = acc
        if use_bn:
            y = y * scale + shift
        if use_act:
            y = _leaky(y)
        out_tiles.append(y.astype(o_ref.dtype).reshape(B, H, W, TCO))

    # Interleave phases in VMEM: out[b, 2m+py, 2n+px, c] = phase[py][px][b,m,n,c]
    row0 = jnp.stack([out_tiles[0], out_tiles[1]], axis=3)         # (B,H,W,2,TCO) : px
    row1 = jnp.stack([out_tiles[2], out_tiles[3]], axis=3)
    full = jnp.stack([row0, row1], axis=2)                         # (B,H,2,W,2,TCO) : py
    o_ref[...] = full.reshape(B, 2 * H, 2 * W, TCO)


def conv_transpose_block(x, w_stacked, gamma2d, beta2d, *, use_bn, use_act, out_dtype):
    B, H, W, C_in = x.shape
    C_out = w_stacked.shape[-1]
    tco = _pick_co_tile(C_out)
    kern = functools.partial(_convT_kernel, use_bn=use_bn, use_act=use_act)
    # TODO(synk): for production batch/resolution add a batch/row grid axis with a
    # 1-pixel halo instead of holding the whole activation in VMEM (v7x 64 MiB budget).
    return pl.pallas_call(
        kern,
        out_shape=jax.ShapeDtypeStruct((B, 2 * H, 2 * W, C_out), out_dtype),
        grid=(C_out // tco,),
        in_specs=[
            pl.BlockSpec((B, H, W, C_in), lambda j: (0, 0, 0, 0)),
            pl.BlockSpec((2, 2, 4 * C_in, tco), lambda j: (0, 0, 0, j)),
            pl.BlockSpec((1, tco), lambda j: (0, j)),
            pl.BlockSpec((1, tco), lambda j: (0, j)),
        ],
        out_specs=pl.BlockSpec((B, 2 * H, 2 * W, tco), lambda j: (0, 0, 0, j)),
        compiler_params=pltpu.CompilerParams(
            # channel tiles are fully independent (BN is per-channel) ->
            # shard across TensorCores on v7x; harmless on 1-TC chips.
            dimension_semantics=("parallel",),
            vmem_limit_bytes=VMEM_LIMIT),
    )(x, w_stacked, gamma2d, beta2d)


# -----------------------------------------------------------------------------
# Parameter init (deterministic, synthetic) + weight prep + forward glue
# -----------------------------------------------------------------------------
def _prep_conv_weight(w, c_in_pad, c_out_pad):
    """(4,4,Cin,Cout) -> phase/tap-stacked bf16 (2,2,4*Cin_pad,Cout_pad)."""
    _, _, c_in, c_out = w.shape
    w = jnp.pad(w, ((0, 0), (0, 0), (0, c_in_pad - c_in), (0, c_out_pad - c_out)))
    rows = []
    for py in range(2):
        cols = []
        for px in range(2):
            taps = [w[3 - py - 2 * dy, 3 - px - 2 * dx]
                    for dy in (0, 1) for dx in (0, 1)]
            cols.append(jnp.concatenate(taps, axis=0))             # (4*Cin_pad, Cout_pad)
        rows.append(jnp.stack(cols, axis=0))
    return jnp.stack(rows, axis=0).astype(jnp.bfloat16)            # (2,2,4*Cin_pad,Cout_pad)


def init_generator_params(key, input_shape, z_dim, classes):
    c_img = input_shape[0]
    w0 = input_shape[1] // 2 ** 5
    h0 = input_shape[2] // 2 ** 5
    keys = jax.random.split(key, 8 + len(classes))
    ki = iter(keys)
    params = {
        "dims": (h0, w0),
        "c_img": c_img,
        "emb": [jax.random.normal(next(ki), (nc, h0 * w0), jnp.float32)
                for nc in classes],
        "w_dense": 0.02 * jax.random.normal(next(ki), (z_dim, 512 * w0 * h0),
                                            jnp.float32),
    }
    chans = [512 + len(classes), 512, 256, 128, 64, c_img]
    chans_pad = [((c + 127) // 128) * 128 for c in chans]          # lane-dense widths
    params["cin0_pad"] = chans_pad[0]
    convs = []
    for i in range(5):
        cin, cout = chans[i], chans[i + 1]
        cin_p, cout_p = chans_pad[i], chans_pad[i + 1]
        wconv = 0.02 * jax.random.normal(next(ki), (4, 4, cin, cout), jnp.float32)
        w_stacked = _prep_conv_weight(wconv, cin_p, cout_p)
        gamma = jnp.ones((1, cout_p), jnp.float32)   # BatchNorm2d default init
        beta = jnp.zeros((1, cout_p), jnp.float32)
        convs.append((w_stacked, gamma, beta))
    params["convs"] = convs
    return params


def generator_forward(params, z, c_list):
    h0, w0 = params["dims"]
    c_img = params["c_img"]
    B = z.shape[0]

    # z -> dense(no bias) + LeakyReLU (Pallas), then NCHW-view -> NHWC (bf16)
    z_feat = dense_leakyrelu(z, params["w_dense"])                 # (B, 512*h*w) bf16
    x = z_feat.reshape(B, 512, h0, w0).transpose(0, 2, 3, 1)       # (B, h, w, 512)

    # class embeddings (gather in glue), view (-1,1,h,w) -> NHWC (B, h, w, 1)
    embeds = []
    for tbl, idx in zip(params["emb"], c_list):
        e = jnp.take(tbl, idx, axis=0)                             # (B, h*w)
        embeds.append(e.reshape(B, 1, h0, w0).transpose(0, 2, 3, 1)
                      .astype(jnp.bfloat16))

    x = jnp.concatenate([x] + embeds, axis=-1)                     # (B, h, w, 512+K)
    pad_c = params["cin0_pad"] - x.shape[-1]                       # lane-dense pad
    if pad_c:
        x = jnp.concatenate([x, jnp.zeros((B, h0, w0, pad_c), x.dtype)], axis=-1)

    n_layers = len(params["convs"])
    for i, (w_st, gamma, beta) in enumerate(params["convs"]):
        last = (i == n_layers - 1)
        # TODO(synk): BatchNorm uses current-batch statistics (training mode);
        # eval-mode running stats of the reference module are not modelled.
        x = conv_transpose_block(
            x, w_st, gamma, beta,
            use_bn=not last, use_act=not last,
            out_dtype=jnp.float32 if last else jnp.bfloat16)

    # drop zero-padded output channels, back to NCHW like the PyTorch module
    return x[..., :c_img].transpose(0, 3, 1, 2)


if __name__ == "__main__":
    key = jax.random.PRNGKey(0)
    input_shape = (3, 32, 32)   # (C, W, H) -> internal h0 = w0 = 1
    z_dim = 32
    classes = (4, 5)
    B = 2

    kp, kz, kc0, kc1 = jax.random.split(key, 4)
    params = init_generator_params(kp, input_shape, z_dim, classes)
    z = jax.random.normal(kz, (B, z_dim), jnp.float32)
    c = [jax.random.randint(kc0, (B,), 0, classes[0], dtype=jnp.int32),
         jax.random.randint(kc1, (B,), 0, classes[1], dtype=jnp.int32)]

    out = generator_forward(params, z, c)
    out = jax.block_until_ready(out)
    assert out.shape == (B, input_shape[0], input_shape[1], input_shape[2]), out.shape
    assert bool(jnp.all(jnp.isfinite(out)))
    print("KERNEL_OK")
</pallas_src>

<mosaic_0001>
module attributes {stable_mosaic.version = 11 : i64} {
  func.func @_dense_kernel(%arg0: i32, %arg1: memref<2x32xbf16, #tpu.memory_space<vmem>>, %arg2: memref<32x512xbf16, #tpu.memory_space<vmem>>, %arg3: memref<2x512xbf16, #tpu.memory_space<vmem>>) attributes {dimension_semantics = [#tpu.dimension_semantics<parallel>], iteration_bounds = array<i64: 1>, scalar_prefetch = 0 : i64, scratch_operands = 0 : i64, tpu.core_type = #tpu.core_type<tc>, window_params = [{pipeline_mode = #tpu.pipeline_mode<synchronous>, transform_indices = @transform_0, window_bounds = array<i64: 2, 32>}, {transform_indices = @transform_1, window_bounds = array<i64: 32, 512>}, {transform_indices = @transform_2, window_bounds = array<i64: 2, 512>}]} {
    %c0 = arith.constant 0 : index
    %c0_0 = arith.constant 0 : index
    %0 = vector.load %arg1[%c0, %c0_0] : memref<2x32xbf16, #tpu.memory_space<vmem>>, vector<2x32xbf16>
    %c0_1 = arith.constant 0 : index
    %c0_2 = arith.constant 0 : index
    %1 = vector.load %arg2[%c0_1, %c0_2] : memref<32x512xbf16, #tpu.memory_space<vmem>>, vector<32x512xbf16>
    %cst = arith.constant dense<0.000000e+00> : vector<2x512xf32>
    %2 = tpu.matmul %0, %1, %cst {dimension_numbers = #tpu.dot_dimension_numbers<[1], [0], [0], [1], [0, 0, 1, 1], [], []>} : vector<2x32xbf16>, vector<32x512xbf16>, vector<2x512xf32> -> vector<2x512xf32>
    %cst_3 = arith.constant 0.000000e+00 : f32
    %3 = vector.broadcast %cst_3 : f32 to vector<2x512xf32>
    %4 = arith.cmpf ogt, %2, %3 : vector<2x512xf32>
    %cst_4 = arith.constant 2.000000e-01 : f32
    %5 = vector.broadcast %cst_4 : f32 to vector<2x512xf32>
    %6 = arith.mulf %5, %2 : vector<2x512xf32>
    %7 = arith.select %4, %2, %6 : vector<2x512xi1>, vector<2x512xf32>
    %8 = arith.truncf %7 : vector<2x512xf32> to vector<2x512xbf16>
    %c0_5 = arith.constant 0 : index
    %c0_6 = arith.constant 0 : index
    %9 = vector.load %arg3[%c0_5, %c0_6] : memref<2x512xbf16, #tpu.memory_space<vmem>>, vector<2x512xbf16>
    tpu.vector_store %arg3[%c0_5, %c0_6], %8 {strides = array<i32>} : memref<2x512xbf16, #tpu.memory_space<vmem>>, vector<2x512xbf16>,
    return
  }
  func.func @transform_0(%arg0: i32) -> (i32, i32) {
    %c0_i32 = arith.constant 0 : i32
    %c0_i32_0 = arith.constant 0 : i32
    %c0_i32_1 = arith.constant 0 : i32
    return %c0_i32, %c0_i32_0 : i32, i32
  }
  func.func @transform_1(%arg0: i32) -> (i32, i32) {
    %c0_i32 = arith.constant 0 : i32
    %c0_i32_0 = arith.constant 0 : i32
    return %c0_i32, %arg0 : i32, i32
  }
  func.func @transform_2(%arg0: i32) -> (i32, i32) {
    %c0_i32 = arith.constant 0 : i32
    %c0_i32_0 = arith.constant 0 : i32
    return %c0_i32, %arg0 : i32, i32
  }
}

</mosaic_0001>

<bundles_post_ra>
// kernel: tpu_custom_call.1
= control target key start
LH: loop header
LB: loop body
LE: loop exit
PB: predicated region body
PF: predicated region fallthrough
CT: control target
= control target key end

     0   :  { %7 = vsyncpa [#allocation3], 0  ;;  %s405_s0 = inlined_call_operand.hbm [shape: bf16[2,32], index: 0, kind: input, shape index: {}]   ;;  %s406_s1 = inlined_call_operand.hbm [shape: bf16[32,512], index: 1, kind: input, shape index: {}]   ;;  %s407_s2 = inlined_call_operand.hbm [shape: bf16[2,512], index: 2, kind: output, shape index: {}]  }
   0x1   :  { %8 = vsyncpa [#allocation6], 0 }
   0x2   :  { %9 = vsyncpa [#allocation4], 0  ;;  %s340_s9 = smov [#allocation2]   ;;  %s341_s11 = smov [#allocation5]  }
   0x3   :  { %s16_s10 = sshll.u32 %s340_s9, 4  ;;  %s25_s12 = sshll.u32 %s341_s11, 4  ;;  %s17_s10 = int_to_ptr.vmem [resolvable:$true] %s16_s10  ;;  %s362_s12 = int_to_ptr.vmem [resolvable:$true] %s25_s12 }
   0x4   :  { %s268_s15 = scalar_lea.hbm %s405_s0, 16 }
   0x5   :  { %p269_p0 = scmp.ne.s32.totalorder %s405_s0, %s268_s15  ;;  %p272_p1 = scmp.lt.u32.totalorder %s268_s15, %s405_s0 }
   0x7   :  { %p274_p2 = pnand %p272_p1, %p269_p0 }
   0x9   :  { %277 = shalt.err (!%p274_p2)
}
   0xa   :  { %s278_s20 = scalar_lea.vmem %s17_s10, 16  ;;  %s282_s21 = scalar_lea.vmem %s17_s10, 32 }
   0xb   :  { %p279_p3 = scmp.ne.s32.totalorder %s17_s10, %s278_s20  ;;  %p283_p4 = scmp.lt.s32.totalorder %s17_s10, %s17_s10 }
   0xc   :  { %p284_p5 = scmp.lt.s32.totalorder %s282_s21, %s278_s20 }
   0xe   :  { %p285_p6 = por %p284_p5, %p283_p4 }
  0x10   :  { %p286_p7 = pnand %p285_p6, %p279_p3 }
  0x12   :  { %289 = shalt.err (!%p286_p7)
}
  0x13   :  { %19 = dma.hbm_to_vmem [thread:$0]  %s405_s0, 16, %s17_s10, [#allocation3]  }
  0x14   :  { %s290_s26 = scalar_lea.hbm %s406_s1, 1024 }
  0x15   :  { %p291_p8 = scmp.ne.s32.totalorder %s406_s1, %s290_s26  ;;  %p294_p9 = scmp.lt.u32.totalorder %s290_s26, %s406_s1 }
  0x17   :  { %p296_p10 = pnand %p294_p9, %p291_p8 }
  0x19   :  { %299 = shalt.err (!%p296_p10)
}
  0x1a   :  { %s300_s3 = scalar_lea.vmem %s362_s12, 1024  ;;  %p305_p12 = scmp.lt.s32.totalorder %s362_s12, %s362_s12 }
  0x1b   :  { %p301_p11 = scmp.ne.s32.totalorder %s362_s12, %s300_s3  ;;  %p306_p13 = scmp.lt.s32.totalorder %s300_s3, %s300_s3 }
  0x1d   :  { %p307_p0 = por %p306_p13, %p305_p12 }
  0x1f   :  { %p308_p1 = pnand %p307_p0, %p301_p11 }
  0x21   :  { %311 = shalt.err (!%p308_p1)
}
  0x22   :  { %s342_s0 = smov 256   ;;  %s343_s4 = smov 16  }
  0x23   :  { %31 = dma.hbm_to_vmem [thread:$0]  %s406_s1, 1024, %s362_s12, [#allocation6], %s342_s0, %s342_s0, %s343_s4  }
  0x24   :  { %334 = dma.done.wait [#allocation3], 16  }
  0x25   :  { %335 = vsyncadd [#allocation3], 4294967280 }
  0x26   :  { %336 = dma.done.wait [#allocation6], 1024  }
  0x27   :  { %337 = vsyncadd [#allocation6], 4294966272  ;;  %v344_v0 = vmov 0   ;;  %v256_v1 = vld [vmem:[#allocation5 + $0x4] ss:$16 sps:$4 sm:$0xff]   ;;  %vm88_vm0 = vcmask 261120   ;;  %v199_v12 = vlaneseq }
  0x28   :  { %124 = vmatprep.mubr.bf16.mxu0 %v344_v0  ;;  %165 = vmatprep.mubr.bf16.mxu1 %v344_v0  ;;  %v258_v2 = vld [vmem:[#allocation5 + $0xc] ss:$16 sps:$4 sm:$0xff]   ;;  %v260_v3 = vld [vmem:[#allocation5] ss:$16 sps:$4 sm:$0xff]   ;;  %v261_v4 = vld [vmem:[#allocation5 + $0x8] ss:$16 sps:$4 sm:$0xff]  }
  0x29   :  { %92 = vmatprep.subr.bf16.mxu0 %v256_v1  ;;  %133 = vmatprep.subr.bf16.mxu1 %v258_v2  ;;  %v262_v5 = vld [vmem:[#allocation5 + $0x24] ss:$16 sps:$4 sm:$0xff]   ;;  %v264_v6 = vld [vmem:[#allocation5 + $0x2c] ss:$16 sps:$4 sm:$0xff]   ;;  %v266_v7 = vld [vmem:[#allocation5 + $0x20] ss:$16 sps:$4 sm:$0xff]  }
  0x2a   :  { %93 = vmatpush1.bf16.msra.mxu0 %v260_v3  ;;  %134 = vmatpush1.bf16.msra.mxu1 %v261_v4  ;;  %v267_v8 = vld [vmem:[#allocation5 + $0x28] ss:$16 sps:$4 sm:$0xff]   ;;  %v39_v9 = vld [vmem:[#allocation2] sm:$0x1]  ;;  %v345_v10 = vmov 1966171168  }
  0x2b   :  { %94 = vmatprep.subr.bf16.mxu0 %v262_v5  ;;  %135 = vmatprep.subr.bf16.mxu1 %v264_v6  ;;  %v197_v11 = vunpack.c.l.s4 %v345_v10  ;;  %v200_v16 = vshrl.u32 %v199_v12, 7  ;;  %s346_s1 = smov [#allocation7]  }
  0x2c   :  { %s226_s7 = sshll.u32 %s346_s1, 4  ;;  %s227_s7 = int_to_ptr.vmem [resolvable:$true] %s226_s7 }
  0x2d   :  { %v198_v15 = vunpack.c.0.s8 %v197_v11  ;;  %s312_s8 = scalar_lea.vmem %s227_s7, 64  ;;  %p317_p3 = scmp.lt.s32.totalorder %s227_s7, %s227_s7 }
  0x2e   :  { %95 = vmatpush1.bf16.msra.mxu0 %v266_v7  ;;  %136 = vmatpush1.bf16.msra.mxu1 %v267_v8  ;;  %p313_p2 = scmp.ne.s32.totalorder %s227_s7, %s312_s8  ;;  %p318_p4 = scmp.lt.s32.totalorder %s312_s8, %s312_s8 }
  0x2f   :  { %v201_v29 = vsub.s32 %v198_v15, %v200_v16 }
  0x30   :  { %p319_p5 = por %p318_p4, %p317_p3 }
  0x31   :  { %244 = vmatmul.mubr.msk.bf16.vlgmr.msra.gmra.mrb[0].mxu0 %vm88_vm0, %v39_v9  ;;  %245 = vmatmul.mubr.msk.bf16.vlgmr.msra.gmra.mrb[0].mxu1 %vm88_vm0, %v39_v9 }
  0x32   :  { %p320_p6 = pnand %p319_p5, %p313_p2 }
 0x104   :  { %v126_v13 = vpop.f32.mrb[0].mxu0  ;;  %v167_v14 = vpop.f32.mrb[0].mxu1 }
 0x105   :  { %vm174_vm1 = vcmp.gt.f32.partialorder %v126_v13, 0.0  ;;  %v178_v17 = vmul.f32 0.2, %v126_v13  ;;  %vm176_vm2 = vcmp.gt.f32.partialorder %v167_v14, 0.0  ;;  %v180_v18 = vmul.f32 0.2, %v167_v14 }
 0x106   :  { %v128_v19 = vpop.f32.mrb[1].mxu0  ;;  %v169_v20 = vpop.f32.mrb[1].mxu1 }
 0x107   :  { %v182_v21 = vsel %vm174_vm1, %v126_v13, %v178_v17  ;;  %vm175_vm3 = vcmp.gt.f32.partialorder %v128_v19, 0.0  ;;  %v179_v22 = vmul.f32 0.2, %v128_v19  ;;  %v130_v23 = vpop.f32.mrb[2].mxu0  ;;  %v171_v24 = vpop.f32.mrb[2].mxu1  ;;  %v184_v25 = vsel %vm176_vm2, %v167_v14, %v180_v18 }
 0x108   :  { %vm177_vm4 = vcmp.gt.f32.partialorder %v169_v20, 0.0  ;;  %v181_v26 = vmul.f32 0.2, %v169_v20  ;;  %v131_v27 = vpop.f32.mrb[3].mxu0  ;;  %v172_v28 = vpop.f32.mrb[3].mxu1 }
 0x109   :  { %v183_v30 = vsel %vm175_vm3, %v128_v19, %v179_v22 }
 0x10a   :  { %v246_v31 = vpack.c.bf16 %v183_v30, %v182_v21  ;;  %v185_v32 = vsel %vm177_vm4, %v169_v20, %v181_v26 }
 0x10b   :  { %v247_v33 = vpack.c.bf16 %v185_v32, %v184_v25 }
 0x10c   :  { %v202_v34 = vrot.slane %v246_v31, %v201_v29 }
 0x10d   :  { %v209_v35 = vrot.slane %v247_v33, %v201_v29 }
 0x10f   :  { %v210_v36 = vcombine.low %v202_v34, %v209_v35 }
 0x111   :  { %248 = vst.sshfl [vmem:[#allocation7] sm:$0x55 pattern:$0x73625140] %v210_v36 }
 0x112   :  { %323 = shalt.err (!%p320_p6)
}
 0x113   :  { %s324_s11 = scalar_lea.hbm %s407_s2, 64 }
 0x114   :  { %p325_p7 = scmp.ne.s32.totalorder %s407_s2, %s324_s11  ;;  %p328_p8 = scmp.lt.u32.totalorder %s324_s11, %s407_s2 }
 0x116   :  { %p330_p9 = pnand %p328_p8, %p325_p7 }
 0x118   :  { %333 = shalt.err (!%p330_p9)
}
 0x119   :  { %229 = dma.vmem_to_hbm [thread:$0]  %s227_s7, 64, %s407_s2, [#allocation4]  }
 0x11a   :  { %338 = dma.done.wait [#allocation4], 64  }
 0x11b   :  { %339 = vsyncadd [#allocation4], 4294967232 }
 0x11c   :  { %233 = vsyncpa [#allocation3], 1 }
 0x11d   :  { %234 = vsyncpa [#allocation6], 1 }
 0x11e   :  { %235 = vsyncpa [#allocation4], 1 }

</bundles_post_ra>
